<compile_context>
chip_gen: v7x
topology: tpu7x:2x2x1
jax: 0.10.0
libtpu: 0.0.40
codegen_flags: <defaults>
</compile_context>

<pallas_src>
import jax
import jax.numpy as jnp
from jax.experimental import pallas as pl
from jax.experimental.pallas import tpu as pltpu


def _round_up(x, m):
    return ((x + m - 1) // m) * m


def _ffn_kernel(x_ref, w1_ref, b1_ref, w2_ref, b2_ref, o_ref, acc_ref):
    # x_ref  : (tm, Hp)        w1_ref : (Hp, tpf)     b1_ref : (1, tpf)
    # w2_ref : (tpf, Hp)       b2_ref : (1, Hp)
    # o_ref  : (tm, Hp)        acc_ref: (tm, Hp) f32 scratch (resident)
    j = pl.program_id(1)

    @pl.when(j == 0)
    def _():
        acc_ref[...] = jnp.zeros_like(acc_ref)

    # First matmul in the weight dtype (bf16 weights -> bf16 MXU), f32 accumulate.
    x = x_ref[...].astype(w1_ref.dtype)
    h = jnp.dot(x, w1_ref[...], preferred_element_type=jnp.float32) + b1_ref[...]
    h = jnp.maximum(h, 0.0)                      # relu
    # dropout == identity at inference

    acc_ref[...] += jnp.dot(h.astype(w2_ref.dtype), w2_ref[...],
                            preferred_element_type=jnp.float32)

    # Finalize: bias-2 add + downcast + store only once, on the last pf step.
    @pl.when(j == pl.num_programs(1) - 1)
    def _():
        o_ref[...] = (acc_ref[...] + b2_ref[...]).astype(o_ref.dtype)


def positionwise_ffn(x, w1, b1, w2, b2, *, tile_m=256, tile_pf=512,
                     vmem_budget_bytes=56 * 1024 * 1024):
    """x: [B, S, hid]; w1: [hid, pf]; b1: [pf]; w2: [pf, hid]; b2: [hid]."""
    B, S, H = x.shape
    PF = w1.shape[1]
    assert w1.shape == (H, PF) and w2.shape == (PF, H)
    assert b1.shape == (PF,) and b2.shape == (H,)

    M = B * S
    dtype = x.dtype
    itemsize = jnp.dtype(dtype).itemsize
    # Sublane packing for the row (second-minor) axis.
    sublane = 16 if dtype == jnp.bfloat16 else 8

    # Lane-dense padding of the feature dims.
    H_p = _round_up(H, 128)
    PF_128 = _round_up(PF, 128)

    # Row tile: multiple of the sublane count, capped at (rounded) M.
    tm = min(_round_up(tile_m, sublane), _round_up(M, sublane))
    tm = max(tm, sublane)
    # pf tile: multiple of 128, capped at PF_128.
    tpf = min(_round_up(tile_pf, 128), PF_128)
    tpf = max(tpf, 128)

    def vmem_estimate(tm_, tpf_):
        # Double-buffered pipeline inputs/outputs + f32 accumulator + h intermediate.
        dbuf = 2 * itemsize * (tm_ * H_p            # x tile
                               + H_p * tpf_ + tpf_  # w1 tile, b1 tile
                               + tpf_ * H_p + H_p   # w2 tile, b2
                               + tm_ * H_p)         # out tile
        return dbuf + 4 * tm_ * H_p + 4 * tm_ * tpf_

    # Auto-shrink tiles to fit the VMEM budget (sized for v7x's 64 MiB VMEM;
    # also comfortably under v5e/v6e limits once vmem_limit_bytes is raised).
    while vmem_estimate(tm, tpf) > vmem_budget_bytes and tpf > 128:
        tpf = max(128, tpf // 2)
    while vmem_estimate(tm, tpf) > vmem_budget_bytes and tm > sublane:
        tm = max(sublane, _round_up(tm // 2, sublane))

    # Pad so the tiles divide evenly.
    M_p = _round_up(M, tm)
    PF_p = _round_up(PF_128, tpf)

    x2 = jnp.pad(x.reshape(M, H), ((0, M_p - M), (0, H_p - H)))
    w1_p = jnp.pad(w1, ((0, H_p - H), (0, PF_p - PF)))
    b1_p = jnp.pad(b1, (0, PF_p - PF)).reshape(1, PF_p)
    w2_p = jnp.pad(w2, ((0, PF_p - PF), (0, H_p - H)))
    b2_p = jnp.pad(b2, (0, H_p - H)).reshape(1, H_p)

    grid = (M_p // tm, PF_p // tpf)

    cost = pl.CostEstimate(
        flops=4 * M_p * H_p * PF_p,  # two matmuls, 2*M*K*N each
        transcendentals=0,
        bytes_accessed=itemsize * (2 * M_p * H_p
                                   + grid[0] * (H_p * PF_p + PF_p * H_p + PF_p + H_p)),
    )

    out2 = pl.pallas_call(
        _ffn_kernel,
        out_shape=jax.ShapeDtypeStruct((M_p, H_p), dtype),
        grid_spec=pltpu.PrefetchScalarGridSpec(
            num_scalar_prefetch=0,
            grid=grid,
            in_specs=[
                pl.BlockSpec((tm, H_p), lambda i, j: (i, 0)),   # x row tile (resident over j)
                pl.BlockSpec((H_p, tpf), lambda i, j: (0, j)),  # W1 pf slab (streamed)
                pl.BlockSpec((1, tpf), lambda i, j: (0, j)),    # b1 pf slab
                pl.BlockSpec((tpf, H_p), lambda i, j: (j, 0)),  # W2 pf slab (streamed)
                pl.BlockSpec((1, H_p), lambda i, j: (0, 0)),    # b2
            ],
            out_specs=pl.BlockSpec((tm, H_p), lambda i, j: (i, 0)),
            scratch_shapes=[pltpu.VMEM((tm, H_p), jnp.float32)],
        ),
        compiler_params=pltpu.CompilerParams(
            dimension_semantics=("parallel", "arbitrary"),
            vmem_limit_bytes=vmem_budget_bytes,
        ),
        cost_estimate=cost,
    )(x2, w1_p, b1_p, w2_p, b2_p)

    return out2[:M, :H].reshape(B, S, H)


def _reference(x, w1, b1, w2, b2):
    h = jnp.maximum(jnp.einsum("bsh,hp->bsp", x, w1) + b1, 0.0)
    return jnp.einsum("bsp,ph->bsh", h, w2) + b2


if __name__ == "__main__":
    # Small shapes consistent with the module: batch=2, seq=8, hid_dim=32, pf_dim=64
    B, S, HID, PF = 2, 8, 32, 64
    key = jax.random.PRNGKey(0)
    kx, k1, k2, k3, k4 = jax.random.split(key, 5)

    x = jax.random.normal(kx, (B, S, HID), dtype=jnp.float32)

    # Deterministic parameter init (PyTorch Linear-style uniform bounds),
    # stored already transposed for "x @ W" convention.
    bound1 = 1.0 / (HID ** 0.5)
    w1 = jax.random.uniform(k1, (HID, PF), jnp.float32, -bound1, bound1)
    b1 = jax.random.uniform(k2, (PF,), jnp.float32, -bound1, bound1)
    bound2 = 1.0 / (PF ** 0.5)
    w2 = jax.random.uniform(k3, (PF, HID), jnp.float32, -bound2, bound2)
    b2 = jax.random.uniform(k4, (HID,), jnp.float32, -bound2, bound2)

    out = positionwise_ffn(x, w1, b1, w2, b2)
    out = jax.block_until_ready(out)

    ref = _reference(x, w1, b1, w2, b2)
    assert out.shape == (B, S, HID)
    assert jnp.allclose(out, ref, atol=1e-5, rtol=1e-5), "mismatch vs reference"

    print("KERNEL_OK")
</pallas_src>

<mosaic_0001>
module attributes {stable_mosaic.version = 11 : i64} {
  func.func @_ffn_kernel(%arg0: i32, %arg1: i32, %arg2: memref<16x128xf32, #tpu.memory_space<vmem>>, %arg3: memref<128x128xf32, #tpu.memory_space<vmem>>, %arg4: memref<1x128xf32, #tpu.memory_space<vmem>>, %arg5: memref<128x128xf32, #tpu.memory_space<vmem>>, %arg6: memref<1x128xf32, #tpu.memory_space<vmem>>, %arg7: memref<16x128xf32, #tpu.memory_space<vmem>>, %arg8: memref<16x128xf32, #tpu.memory_space<vmem>>) attributes {dimension_semantics = [#tpu.dimension_semantics<parallel>, #tpu.dimension_semantics<arbitrary>], iteration_bounds = array<i64: 1, 1>, scalar_prefetch = 0 : i64, scratch_operands = 1 : i64, tpu.core_type = #tpu.core_type<tc>, window_params = [{transform_indices = @transform_0, window_bounds = array<i64: 16, 128>}, {transform_indices = @transform_1, window_bounds = array<i64: 128, 128>}, {transform_indices = @transform_2, window_bounds = array<i64: 1, 128>}, {transform_indices = @transform_3, window_bounds = array<i64: 128, 128>}, {pipeline_mode = #tpu.pipeline_mode<synchronous>, transform_indices = @transform_4, window_bounds = array<i64: 1, 128>}, {transform_indices = @transform_5, window_bounds = array<i64: 16, 128>}]} {
    %c0_i32 = arith.constant 0 : i32
    %0 = arith.cmpi eq, %arg1, %c0_i32 : i32
    %1 = arith.extui %0 : i1 to i32
    %c0_i32_0 = arith.constant 0 : i32
    %2 = arith.cmpi ne, %1, %c0_i32_0 : i32
    scf.if %2 {
      %cst_16 = arith.constant 0.000000e+00 : f32
      %19 = vector.broadcast %cst_16 : f32 to vector<16x128xf32>
      %c0_17 = arith.constant 0 : index
      %c0_18 = arith.constant 0 : index
      %20 = vector.load %arg8[%c0_17, %c0_18] : memref<16x128xf32, #tpu.memory_space<vmem>>, vector<16x128xf32>
      tpu.vector_store %arg8[%c0_17, %c0_18], %19 {strides = array<i32>} : memref<16x128xf32, #tpu.memory_space<vmem>>, vector<16x128xf32>,
    } else {
    }
    %c0 = arith.constant 0 : index
    %c0_1 = arith.constant 0 : index
    %3 = vector.load %arg2[%c0, %c0_1] : memref<16x128xf32, #tpu.memory_space<vmem>>, vector<16x128xf32>
    %c0_2 = arith.constant 0 : index
    %c0_3 = arith.constant 0 : index
    %4 = vector.load %arg3[%c0_2, %c0_3] : memref<128x128xf32, #tpu.memory_space<vmem>>, vector<128x128xf32>
    %cst = arith.constant dense<0.000000e+00> : vector<16x128xf32>
    %5 = tpu.matmul %3, %4, %cst {dimension_numbers = #tpu.dot_dimension_numbers<[1], [0], [0], [1], [0, 0, 1, 1], [], []>} : vector<16x128xf32>, vector<128x128xf32>, vector<16x128xf32> -> vector<16x128xf32>
    %c0_4 = arith.constant 0 : index
    %c0_5 = arith.constant 0 : index
    %6 = vector.load %arg4[%c0_4, %c0_5] : memref<1x128xf32, #tpu.memory_space<vmem>>, vector<1x128xf32>
    %7 = vector.broadcast %6 : vector<1x128xf32> to vector<16x128xf32>
    %8 = arith.addf %5, %7 : vector<16x128xf32>
    %cst_6 = arith.constant 0.000000e+00 : f32
    %9 = vector.broadcast %cst_6 : f32 to vector<16x128xf32>
    %10 = arith.maximumf %8, %9 : vector<16x128xf32>
    %c0_7 = arith.constant 0 : index
    %c0_8 = arith.constant 0 : index
    %11 = vector.load %arg8[%c0_7, %c0_8] : memref<16x128xf32, #tpu.memory_space<vmem>>, vector<16x128xf32>
    %c0_9 = arith.constant 0 : index
    %c0_10 = arith.constant 0 : index
    %12 = vector.load %arg5[%c0_9, %c0_10] : memref<128x128xf32, #tpu.memory_space<vmem>>, vector<128x128xf32>
    %cst_11 = arith.constant dense<0.000000e+00> : vector<16x128xf32>
    %13 = tpu.matmul %10, %12, %cst_11 {dimension_numbers = #tpu.dot_dimension_numbers<[1], [0], [0], [1], [0, 0, 1, 1], [], []>} : vector<16x128xf32>, vector<128x128xf32>, vector<16x128xf32> -> vector<16x128xf32>
    %14 = arith.addf %11, %13 : vector<16x128xf32>
    %c0_12 = arith.constant 0 : index
    %c0_13 = arith.constant 0 : index
    %15 = vector.load %arg8[%c0_12, %c0_13] : memref<16x128xf32, #tpu.memory_space<vmem>>, vector<16x128xf32>
    tpu.vector_store %arg8[%c0_12, %c0_13], %14 {strides = array<i32>} : memref<16x128xf32, #tpu.memory_space<vmem>>, vector<16x128xf32>,
    %c0_i32_14 = arith.constant 0 : i32
    %16 = arith.cmpi eq, %arg1, %c0_i32_14 : i32
    %17 = arith.extui %16 : i1 to i32
    %c0_i32_15 = arith.constant 0 : i32
    %18 = arith.cmpi ne, %17, %c0_i32_15 : i32
    scf.if %18 {
      %c0_16 = arith.constant 0 : index
      %c0_17 = arith.constant 0 : index
      %19 = vector.load %arg8[%c0_16, %c0_17] : memref<16x128xf32, #tpu.memory_space<vmem>>, vector<16x128xf32>
      %c0_18 = arith.constant 0 : index
      %c0_19 = arith.constant 0 : index
      %20 = vector.load %arg6[%c0_18, %c0_19] : memref<1x128xf32, #tpu.memory_space<vmem>>, vector<1x128xf32>
      %21 = vector.broadcast %20 : vector<1x128xf32> to vector<16x128xf32>
      %22 = arith.addf %19, %21 : vector<16x128xf32>
      %c0_20 = arith.constant 0 : index
      %c0_21 = arith.constant 0 : index
      %23 = vector.load %arg7[%c0_20, %c0_21] : memref<16x128xf32, #tpu.memory_space<vmem>>, vector<16x128xf32>
      tpu.vector_store %arg7[%c0_20, %c0_21], %22 {strides = array<i32>} : memref<16x128xf32, #tpu.memory_space<vmem>>, vector<16x128xf32>,
    } else {
    }
    return
  }
  func.func @transform_0(%arg0: i32, %arg1: i32) -> (i32, i32) {
    %c0_i32 = arith.constant 0 : i32
    %c0_i32_0 = arith.constant 0 : i32
    return %arg0, %c0_i32 : i32, i32
  }
  func.func @transform_1(%arg0: i32, %arg1: i32) -> (i32, i32) {
    %c0_i32 = arith.constant 0 : i32
    %c0_i32_0 = arith.constant 0 : i32
    return %c0_i32, %arg1 : i32, i32
  }
  func.func @transform_2(%arg0: i32, %arg1: i32) -> (i32, i32) {
    %c0_i32 = arith.constant 0 : i32
    %c0_i32_0 = arith.constant 0 : i32
    return %c0_i32, %arg1 : i32, i32
  }
  func.func @transform_3(%arg0: i32, %arg1: i32) -> (i32, i32) {
    %c0_i32 = arith.constant 0 : i32
    %c0_i32_0 = arith.constant 0 : i32
    return %arg1, %c0_i32 : i32, i32
  }
  func.func @transform_4(%arg0: i32, %arg1: i32) -> (i32, i32) {
    %c0_i32 = arith.constant 0 : i32
    %c0_i32_0 = arith.constant 0 : i32
    %c0_i32_1 = arith.constant 0 : i32
    return %c0_i32, %c0_i32_0 : i32, i32
  }
  func.func @transform_5(%arg0: i32, %arg1: i32) -> (i32, i32) {
    %c0_i32 = arith.constant 0 : i32
    %c0_i32_0 = arith.constant 0 : i32
    return %arg0, %c0_i32 : i32, i32
  }
}

</mosaic_0001>

<bundles_post_ra>
// kernel: tpu_custom_call.1
= control target key start
LH: loop header
LB: loop body
LE: loop exit
PB: predicated region body
PF: predicated region fallthrough
CT: control target
= control target key end

     0   :  { %10 = vsyncpa [#allocation4], 0  ;;  %s682_s0 = inlined_call_operand.hbm [shape: f32[16,128], index: 0, kind: input, shape index: {}]   ;;  %s683_s1 = inlined_call_operand.hbm [shape: f32[128,128], index: 1, kind: input, shape index: {}]   ;;  %s684_s2 = inlined_call_operand.vmem [shape: f32[1,128], index: 2, kind: input, shape index: {}]   ;;  %s685_s3 = inlined_call_operand.hbm [shape: f32[128,128], index: 3, kind: input, shape index: {}]   ;;  %s686_s4 = inlined_call_operand.vmem [shape: f32[1,128], index: 4, kind: input, shape index: {}]   ;;  %s687_s5 = inlined_call_operand.hbm [shape: f32[16,128], index: 5, kind: output, shape index: {}]  }
   0x1   :  { %11 = vsyncpa [#allocation7], 0 }
   0x2   :  { %12 = vsyncpa [#allocation5], 0  ;;  %s573_s18 = smov [#allocation6]   ;;  %s574_s20 = smov [#allocation3]  }
   0x3   :  { %s30_s19 = sshll.u32 %s573_s18, 4  ;;  %s18_s21 = sshll.u32 %s574_s20, 4  ;;  %s31_s19 = int_to_ptr.vmem [resolvable:$true] %s30_s19  ;;  %s609_s21 = int_to_ptr.vmem [resolvable:$true] %s18_s21 }
   0x4   :  { %s479_s24 = scalar_lea.hbm %s683_s1, 2048 }
   0x5   :  { %p480_p0 = scmp.ne.s32.totalorder %s683_s1, %s479_s24  ;;  %p483_p1 = scmp.lt.u32.totalorder %s479_s24, %s683_s1 }
   0x7   :  { %p485_p2 = pnand %p483_p1, %p480_p0 }
   0x9   :  { %488 = shalt.err (!%p485_p2)
}
   0xa   :  { %s489_s29 = scalar_lea.vmem %s31_s19, 2048  ;;  %p494_p4 = scmp.lt.s32.totalorder %s31_s19, %s31_s19 }
   0xb   :  { %p490_p3 = scmp.ne.s32.totalorder %s31_s19, %s489_s29  ;;  %p495_p5 = scmp.lt.s32.totalorder %s489_s29, %s489_s29 }
   0xd   :  { %p496_p6 = por %p495_p5, %p494_p4 }
   0xf   :  { %p497_p7 = pnand %p496_p6, %p490_p3 }
  0x11   :  { %500 = shalt.err (!%p497_p7)
}
  0x12   :  { %s575_s30 = smov 128   ;;  %s576_s6 = smov 8  }
  0x13   :  { %36 = dma.hbm_to_vmem [thread:$0]  %s683_s1, 2048, %s31_s19, [#allocation7], %s575_s30, %s575_s30, %s576_s6  }
  0x14   :  { %s501_s11 = scalar_lea.hbm %s682_s0, 256 }
  0x15   :  { %p502_p8 = scmp.ne.s32.totalorder %s682_s0, %s501_s11  ;;  %p505_p9 = scmp.lt.u32.totalorder %s501_s11, %s682_s0 }
  0x17   :  { %p507_p10 = pnand %p505_p9, %p502_p8 }
  0x19   :  { %510 = shalt.err (!%p507_p10)
}
  0x1a   :  { %s511_s16 = scalar_lea.vmem %s609_s21, 256  ;;  %p516_p12 = scmp.lt.s32.totalorder %s609_s21, %s609_s21 }
  0x1b   :  { %p512_p11 = scmp.ne.s32.totalorder %s609_s21, %s511_s16  ;;  %p517_p13 = scmp.lt.s32.totalorder %s511_s16, %s511_s16 }
  0x1d   :  { %p518_p0 = por %p517_p13, %p516_p12 }
  0x1f   :  { %p519_p1 = pnand %p518_p0, %p512_p11 }
  0x21   :  { %522 = shalt.err (!%p519_p1)
}
  0x22   :  { %24 = dma.hbm_to_vmem [thread:$0]  %s682_s0, 256, %s609_s21, [#allocation4], %s575_s30, %s575_s30, %s576_s6  }
  0x23   :  { %s577_s18 = smov [#allocation8]   ;;  %s523_s23 = scalar_lea.hbm %s685_s3, 2048 }
  0x24   :  { %s44_s19 = sshll.u32 %s577_s18, 4  ;;  %p524_p2 = scmp.ne.s32.totalorder %s685_s3, %s523_s23  ;;  %s45_s19 = int_to_ptr.vmem [resolvable:$true] %s44_s19 }
  0x25   :  { %p527_p3 = scmp.lt.u32.totalorder %s523_s23, %s685_s3 }
  0x27   :  { %p529_p4 = pnand %p527_p3, %p524_p2 }
  0x29   :  { %532 = shalt.err (!%p529_p4)
}
  0x2a   :  { %s533_s28 = scalar_lea.vmem %s45_s19, 2048  ;;  %p538_p6 = scmp.lt.s32.totalorder %s45_s19, %s45_s19 }
  0x2b   :  { %p534_p5 = scmp.ne.s32.totalorder %s45_s19, %s533_s28  ;;  %p539_p7 = scmp.lt.s32.totalorder %s533_s28, %s533_s28 }
  0x2d   :  { %p540_p8 = por %p539_p7, %p538_p6 }
  0x2f   :  { %p541_p9 = pnand %p540_p8, %p534_p5 }
  0x31   :  { %544 = shalt.err (!%p541_p9)
}
  0x32   :  { %50 = dma.hbm_to_vmem [thread:$0]  %s685_s3, 2048, %s45_s19, [#allocation7], %s575_s30, %s575_s30, %s576_s6  }
  0x33   :  { %567 = dma.done.wait [#allocation4], 256  }
  0x34   :  { %568 = vsyncadd [#allocation4], 4294967040 }
  0x35   :  { %569 = dma.done.wait [#allocation7], 4096  }
  0x36   :  { %570 = vsyncadd [#allocation7], 4294963200  ;;  %v70_v0 = vld [vmem:[#allocation6] sm:$0xff]  ;;  %v71_v1 = vld [vmem:[#allocation6 + $0x8] sm:$0xff]  ;;  %s578_s9 = smov [#allocation9]  }
  0x37   :  { %v72_v2 = vld [vmem:[#allocation6 + $0x10] sm:$0xff]  ;;  %v409_v3 = vpack.c.bf16 %v71_v1, %v70_v0  ;;  %v73_v4 = vld [vmem:[#allocation6 + $0x18] sm:$0xff]  ;;  %v74_v6 = vld [vmem:[#allocation6 + $0x20] sm:$0xff]  ;;  %s288_s10 = sshll.u32 %s578_s9, 4  ;;  %s289_s10 = int_to_ptr.vmem [resolvable:$true] %s288_s10 }
  0x38   :  { %v413_v5 = vpack.c.bf16 %v73_v4, %v72_v2  ;;  %v75_v7 = vld [vmem:[#allocation6 + $0x28] sm:$0xff]  ;;  %v76_v9 = vld [vmem:[#allocation6 + $0x30] sm:$0xff]  ;;  %v77_v10 = vld [vmem:[#allocation6 + $0x38] sm:$0xff]  ;;  %p550_p11 = scmp.lt.s32.totalorder %s289_s10, %s289_s10 }
  0x39   :  { %410 = vmatprep.subr.bf16.mxu0 %v409_v3  ;;  %v417_v8 = vpack.c.bf16 %v75_v7, %v74_v6  ;;  %v68_v11 = vld [vmem:[#allocation3] sm:$0xff]  ;;  %v172_v12 = vld [vmem:[#allocation8] sm:$0xff]  ;;  %v173_v13 = vld [vmem:[#allocation8 + $0x8] sm:$0xff]  ;;  %v421_v20 = vpack.c.bf16 %v77_v10, %v76_v9 }
  0x3a   :  { %412 = vmatpush3.bf16.msra.mxu0 %v409_v3  ;;  %371 = vmatprep.mubr.f32.mxu0 %v68_v11  ;;  %v174_v14 = vld [vmem:[#allocation8 + $0x10] sm:$0xff]  ;;  %v441_v15 = vpack.c.bf16 %v173_v13, %v172_v12  ;;  %v175_v16 = vld [vmem:[#allocation8 + $0x18] sm:$0xff]  ;;  %v176_v18 = vld [vmem:[#allocation8 + $0x20] sm:$0xff] }
  0x3b   :  { %414 = vmatprep.subr.bf16.mxu0 %v413_v5  ;;  %v445_v17 = vpack.c.bf16 %v175_v16, %v174_v14  ;;  %v177_v19 = vld [vmem:[#allocation8 + $0x28] sm:$0xff]  ;;  %v78_v21 = vld [vmem:[#allocation6 + $0x40] sm:$0xff]  ;;  %v178_v24 = vld [vmem:[#allocation8 + $0x30] sm:$0xff] }
  0x3c   :  { %442 = vmatprep.subr.bf16.mxu1 %v441_v15  ;;  %v79_v22 = vld [vmem:[#allocation6 + $0x48] sm:$0xff]  ;;  %v449_v23 = vpack.c.bf16 %v177_v19, %v176_v18  ;;  %v179_v25 = vld [vmem:[#allocation8 + $0x38] sm:$0xff]  ;;  %v80_v27 = vld [vmem:[#allocation6 + $0x50] sm:$0xff] }
  0x3d   :  { %444 = vmatpush3.bf16.msra.mxu1 %v441_v15  ;;  %v425_v26 = vpack.c.bf16 %v79_v22, %v78_v21  ;;  %v81_v28 = vld [vmem:[#allocation6 + $0x58] sm:$0xff]  ;;  %v453_v29 = vpack.c.bf16 %v179_v25, %v178_v24  ;;  %v180_v30 = vld [vmem:[#allocation8 + $0x40] sm:$0xff]  ;;  %v181_v31 = vld [vmem:[#allocation8 + $0x48] sm:$0xff] }
  0x3e   :  { %416 = vmatpush3.bf16.msra.mxu0 %v413_v5  ;;  %446 = vmatprep.subr.bf16.mxu1 %v445_v17  ;;  %v429_v32 = vpack.c.bf16 %v81_v28, %v80_v27  ;;  %v82_v33 = vld [vmem:[#allocation6 + $0x60] sm:$0xff]  ;;  %v83_v34 = vld [vmem:[#allocation6 + $0x68] sm:$0xff]  ;;  %v457_v35 = vpack.c.bf16 %v181_v31, %v180_v30  ;;  %v182_v36 = vld [vmem:[#allocation8 + $0x50] sm:$0xff] }
  0x3f   :  { %418 = vmatprep.subr.bf16.mxu0 %v417_v8  ;;  %v183_v37 = vld [vmem:[#allocation8 + $0x58] sm:$0xff]  ;;  %v433_v38 = vpack.c.bf16 %v83_v34, %v82_v33  ;;  %v84_v39 = vld [vmem:[#allocation6 + $0x70] sm:$0xff]  ;;  %v184_v42 = vld [vmem:[#allocation8 + $0x60] sm:$0xff] }
  0x40   :  { %v85_v40 = vld [vmem:[#allocation6 + $0x78] sm:$0xff]  ;;  %v461_v41 = vpack.c.bf16 %v183_v37, %v182_v36  ;;  %v185_v43 = vld [vmem:[#allocation8 + $0x68] sm:$0xff]  ;;  %v186_v47 = vld [vmem:[#allocation8 + $0x70] sm:$0xff] }
  0x41   :  { %448 = vmatpush3.bf16.msra.mxu1 %v445_v17  ;;  %v437_v44 = vpack.c.bf16 %v85_v40, %v84_v39  ;;  %v465_v45 = vpack.c.bf16 %v185_v43, %v184_v42  ;;  %v69_v46 = vld [vmem:[#allocation3 + $0x8] sm:$0xff]  ;;  %v301_v50 = vld [vmem:[%s684_s2] ss:$0 sm:$0xff]  ;;  %s545_s2 = scalar_lea.vmem %s289_s10, 256 }
  0x42   :  { %420 = vmatpush3.bf16.msra.mxu0 %v417_v8  ;;  %450 = vmatprep.subr.bf16.mxu1 %v449_v23  ;;  %v187_v48 = vld [vmem:[#allocation8 + $0x78] sm:$0xff]  ;;  %v302_v57 = vld [vmem:[%s686_s4] ss:$0 sm:$0xff]  ;;  %p546_p10 = scmp.ne.s32.totalorder %s289_s10, %s545_s2  ;;  %p551_p12 = scmp.lt.s32.totalorder %s545_s2, %s545_s2 }
  0x43   :  { %422 = vmatprep.subr.bf16.mxu0 %v421_v20  ;;  %v469_v49 = vpack.c.bf16 %v187_v48, %v186_v47 }
  0x44   :  { %p552_p13 = por %p551_p12, %p550_p11 }
  0x45   :  { %452 = vmatpush3.bf16.msra.mxu1 %v449_v23 }
  0x46   :  { %424 = vmatpush3.bf16.msra.mxu0 %v421_v20  ;;  %454 = vmatprep.subr.bf16.mxu1 %v453_v29  ;;  %p553_p0 = pnand %p552_p13, %p546_p10 }
  0x47   :  { %426 = vmatprep.subr.bf16.mxu0 %v425_v26 }
  0x49   :  { %456 = vmatpush3.bf16.msra.mxu1 %v453_v29 }
  0x4a   :  { %428 = vmatpush3.bf16.msra.mxu0 %v425_v26  ;;  %458 = vmatprep.subr.bf16.mxu1 %v457_v35 }
  0x4b   :  { %430 = vmatprep.subr.bf16.mxu0 %v429_v32 }
  0x4d   :  { %460 = vmatpush3.bf16.msra.mxu1 %v457_v35 }
  0x4e   :  { %432 = vmatpush3.bf16.msra.mxu0 %v429_v32  ;;  %462 = vmatprep.subr.bf16.mxu1 %v461_v41 }
  0x4f   :  { %434 = vmatprep.subr.bf16.mxu0 %v433_v38 }
  0x51   :  { %464 = vmatpush3.bf16.msra.mxu1 %v461_v41 }
  0x52   :  { %436 = vmatpush3.bf16.msra.mxu0 %v433_v38  ;;  %466 = vmatprep.subr.bf16.mxu1 %v465_v45 }
  0x53   :  { %438 = vmatprep.subr.bf16.mxu0 %v437_v44 }
  0x55   :  { %468 = vmatpush3.bf16.msra.mxu1 %v465_v45 }
  0x56   :  { %440 = vmatpush3.bf16.msra.mxu0 %v437_v44  ;;  %470 = vmatprep.subr.bf16.mxu1 %v469_v49 }
  0x59   :  { %372 = vmatmul.mubr.f32.vlgmr.msra.gmra.mrb[0].mxu0 %v69_v46  ;;  %472 = vmatpush3.bf16.msra.mxu1 %v469_v49 }
 0x12c   :  { %v373_v51 = vpop.f32.mrb[0].mxu0 }
 0x12d   :  { %v165_v52 = vadd.f32 %v373_v51, %v301_v50  ;;  %v159_v53 = vpop.f32.mrb[1].mxu0 }
 0x12e   :  { %v160_v54 = vadd.f32 %v301_v50, %v159_v53 }
 0x12f   :  { %v169_v56 = vmax.f32 %v165_v52, 0.0 }
 0x130   :  { %v168_v55 = vmax.f32 %v160_v54, 0.0 }
 0x132   :  { %406 = vmatprep.mubr.f32.mxu1 %v168_v55 }
 0x133   :  { %407 = vmatmul.mubr.f32.vlgmr.msra.gmra.mrb[0].mxu1 %v169_v56 }
 0x206   :  { %v408_v58 = vpop.f32.mrb[0].mxu1 }
 0x207   :  { %v280_v59 = vadd.f32 %v408_v58, %v302_v57  ;;  %v254_v60 = vpop.f32.mrb[1].mxu1 }
 0x208   :  { %v279_v61 = vadd.f32 %v302_v57, %v254_v60 }
 0x209   :  { %282 = vst [vmem:[#allocation9 + $0x8] sm:$0xff] %v280_v59 }
 0x20a   :  { %281 = vst [vmem:[#allocation9] sm:$0xff] %v279_v61 }
 0x20b   :  { %556 = shalt.err (!%p553_p0)
}
 0x20c   :  { %s557_s4 = scalar_lea.hbm %s687_s5, 256 }
 0x20d   :  { %p558_p1 = scmp.ne.s32.totalorder %s687_s5, %s557_s4  ;;  %p561_p2 = scmp.lt.u32.totalorder %s557_s4, %s687_s5 }
 0x20f   :  { %p563_p3 = pnand %p561_p2, %p558_p1 }
 0x211   :  { %566 = shalt.err (!%p563_p3)
}
 0x212   :  { %294 = dma.vmem_to_hbm [thread:$0]  %s289_s10, 256, %s687_s5, [#allocation5], %s575_s30, %s575_s30, %s576_s6  }
 0x213   :  { %571 = dma.done.wait [#allocation5], 256  }
 0x214   :  { %572 = vsyncadd [#allocation5], 4294967040 }
 0x215   :  { %298 = vsyncpa [#allocation4], 1 }
 0x216   :  { %299 = vsyncpa [#allocation7], 1 }
 0x217   :  { %300 = vsyncpa [#allocation5], 1 }

</bundles_post_ra>
